<compile_context>
chip_gen: v6e
topology: v6e:2x2x1
jax: 0.10.0
libtpu: 0.0.40
codegen_flags: <defaults>
</compile_context>

<pallas_src>
import functools
import math

import numpy as np

import jax
import jax.numpy as jnp
from jax import lax
from jax.experimental import pallas as pl
from jax.experimental.pallas import tpu as pltpu


# -----------------------------------------------------------------------------
# 1-D polyphase operator for upfirdn(up=2, down=1, pad=(2,1)) with a 4-tap kernel.
# U (2*n_in, n_in):  U @ s  ==  1-D upfirdn(s) with StyleGAN's Upsample padding.
# -----------------------------------------------------------------------------
def _upfir_up2_matrix(n_in, k1d):
    k1d = np.asarray(k1d, np.float64)
    kw = len(k1d)
    factor = 2
    p = kw - factor
    pad0 = (p + 1) // 2 + factor - 1          # = 2 for the 4-tap kernel
    pad1 = p // 2                             # = 1
    n_up = n_in * factor                      # zero-upsampled length (trailing zero included)
    n_out = n_up + pad0 + pad1 - kw + 1       # = 2 * n_in
    kflip = k1d[::-1]
    u = np.zeros((n_out, n_in), np.float32)
    for y in range(n_out):
        for t in range(kw):
            pidx = y + t - pad0
            if 0 <= pidx < n_up and pidx % factor == 0:
                u[y, pidx // factor] += kflip[t]
    return u


# -----------------------------------------------------------------------------
# Pallas kernel: one group of `merge` batch elements per grid step.
# -----------------------------------------------------------------------------
def _torgb_kernel(x_ref, style_ref, wmodT_ref, bmod_ref, wconv_ref, bconv_ref,
                  *rest, scale_mod, scale_conv, merge, has_skip):
    # x_ref     : (1, merge*C, HW)    activations, channels on sublanes, HW on lanes
    # style_ref : (1, merge, S)       style rows of this group
    # wmodT_ref : (S, C)              EqualLinear weight, transposed
    # bmod_ref  : (1, C)              EqualLinear bias
    # wconv_ref : (4, C)              1x1 modulated-conv weight
    # bconv_ref : (4*merge, 1)        ToRGB bias (tiled per merged batch)
    # rest      : [skip_ref (1, 4*merge*Hs, Ws), uh_ref (H, Hs), uwT_ref (Ws, W)], o_ref
    if has_skip:
        skip_ref, uh_ref, uwT_ref, o_ref = rest
    else:
        (o_ref,) = rest

    x = x_ref[0]                                    # (merge*C, HW), native dtype (no upcast)
    c_in = x.shape[0] // merge

    # EqualLinear modulation (tiny f32 matmul).
    sty = style_ref[0].astype(jnp.float32)          # (merge, S)
    style_mod = scale_mod * jnp.dot(sty, wmodT_ref[...],
                                    preferred_element_type=jnp.float32) + bmod_ref[...]  # (merge, C)

    # Block-diagonal modulated weight (4*merge, merge*C), built from tiny (4, C) blocks,
    # cast to the activation dtype so the MXU sees native-dtype operands.
    wbase = scale_conv * wconv_ref[...]             # (4, C) f32
    rows = []
    for j in range(merge):
        mj = (wbase * style_mod[j:j + 1, :]).astype(x.dtype)       # (4, C)
        if merge == 1:
            rows.append(mj)
        else:
            blocks = [mj if k == j else jnp.zeros((4, c_in), x.dtype) for k in range(merge)]
            rows.append(jnp.concatenate(blocks, axis=1))           # (4, merge*C)
    m_blk = rows[0] if merge == 1 else jnp.concatenate(rows, axis=0)   # (4*merge, merge*C)

    # 1x1 modulated conv == one matmul; sublane-dense (4*merge rows) output.
    acc = jnp.dot(m_blk, x, preferred_element_type=jnp.float32)    # (4*merge, HW) f32
    acc = acc + bconv_ref[...]                                      # (4*merge, 1) lane-broadcast

    if has_skip:
        nc = 4 * merge
        sk = skip_ref[0]                                            # (nc*Hs, Ws), native dtype
        hs = sk.shape[0] // nc
        h_out = uh_ref.shape[0]
        w_out = uwT_ref.shape[1]

        # Exact separable upfirdn (up=2): W-pass then H-pass, both on the MXU.
        uwT = uwT_ref[...].astype(sk.dtype)                         # (Ws, W)
        t = jnp.dot(sk, uwT, preferred_element_type=jnp.float32)    # (nc*Hs, W) f32
        t3 = t.reshape(nc, hs, w_out)                               # leading split (minor dim kept)
        uh_b = jnp.broadcast_to(uh_ref[...][None, :, :], (nc, h_out, hs))
        up3 = lax.dot_general(uh_b, t3,
                              dimension_numbers=(((2,), (1,)), ((0,), (0,))),
                              preferred_element_type=jnp.float32)   # (nc, H, W)
        # Flatten (nc, H, W) -> (nc, H*W) with a lane-dim concatenate (layout-safe).
        up_flat = jnp.concatenate([up3[:, h, :] for h in range(h_out)], axis=-1)
        acc = acc + up_flat

    o_ref[0] = acc.astype(o_ref.dtype)


# -----------------------------------------------------------------------------
# Wrapper
# -----------------------------------------------------------------------------
def torgb_pallas(x, style, w_mod, b_mod, w_conv, b_conv, skip=None,
                 blur_kernel=(1, 3, 3, 1)):
    """x: (B, C, H, W); style: (B, S); skip: (B, 4, H//2, W//2) or None. Returns (B, 4, H, W)."""
    b, c, h, w = x.shape
    hw = h * w
    s_dim = style.shape[1]
    out_dtype = x.dtype

    merge = 2 if (b % 2 == 0 and b >= 2) else 1     # batch-pair merge -> sublane-dense stores
    g = b // merge
    nc = 4 * merge

    # Pure (row-major) reshapes only -- no HBM transposes.
    x_flat = x.reshape(g, merge * c, hw)
    style3 = style.reshape(g, merge, s_dim)

    scale_mod = 1.0 / math.sqrt(s_dim)              # EqualLinear scale (lr_mul=1)
    scale_conv = 1.0 / math.sqrt(c * 1 * 1)         # ModulatedConv2d scale, kernel_size=1

    wmodT = jnp.asarray(w_mod, jnp.float32).T                       # (S, C)
    bmod = jnp.asarray(b_mod, jnp.float32).reshape(1, c)            # (1, C)
    wconv = jnp.asarray(w_conv, jnp.float32).reshape(4, c)          # (4, C)
    bconv = jnp.tile(jnp.asarray(b_conv, jnp.float32).reshape(4, 1), (merge, 1))   # (nc, 1)

    has_skip = skip is not None
    inputs = [x_flat, style3, wmodT, bmod, wconv, bconv]
    in_specs = [
        pl.BlockSpec((1, merge * c, hw), lambda i: (i, 0, 0)),      # x (per group)
        pl.BlockSpec((1, merge, s_dim), lambda i: (i, 0, 0)),       # style (per group)
        pl.BlockSpec((s_dim, c), lambda i: (0, 0)),                 # W_mod^T (constant)
        pl.BlockSpec((1, c), lambda i: (0, 0)),                     # b_mod
        pl.BlockSpec((4, c), lambda i: (0, 0)),                     # W_conv
        pl.BlockSpec((nc, 1), lambda i: (0, 0)),                    # bias (tiled)
    ]

    itemsize = jnp.dtype(x.dtype).itemsize
    flops = 2 * 4 * c * hw * b + 2 * b * s_dim * c
    bytes_accessed = (x.size * itemsize + b * 4 * hw * jnp.dtype(out_dtype).itemsize
                      + style.size * jnp.dtype(style.dtype).itemsize
                      + (wmodT.size + bmod.size + wconv.size + bconv.size) * 4)

    if has_skip:
        bs, cs, hs, ws = skip.shape
        assert bs == b and cs == 4 and hs * 2 == h and ws * 2 == w, "skip must be (B,4,H/2,W/2)"
        a1d = np.asarray(blur_kernel, np.float64)
        a1d = a1d / a1d.sum() * 2.0                 # separable 1-D factor of make_kernel(k)*4
        uh = jnp.asarray(_upfir_up2_matrix(hs, a1d))        # (H, Hs)  -- tiny constant
        uwT = jnp.asarray(_upfir_up2_matrix(ws, a1d).T)     # (Ws, W)  -- tiny constant
        skip2 = skip.reshape(g, nc * hs, ws)                # pure reshape
        inputs += [skip2, uh, uwT]
        in_specs += [
            pl.BlockSpec((1, nc * hs, ws), lambda i: (i, 0, 0)),    # skip (per group)
            pl.BlockSpec((h, hs), lambda i: (0, 0)),                # U_h   (constant)
            pl.BlockSpec((ws, w), lambda i: (0, 0)),                # U_w^T (constant)
        ]
        flops += 2 * b * 4 * hs * ws * w + 2 * b * 4 * hs * h * w
        bytes_accessed += skip.size * jnp.dtype(skip.dtype).itemsize + (uh.size + uwT.size) * 4

    kernel = functools.partial(_torgb_kernel, scale_mod=scale_mod,
                               scale_conv=scale_conv, merge=merge, has_skip=has_skip)

    out_flat = pl.pallas_call(
        kernel,
        out_shape=jax.ShapeDtypeStruct((g, nc, hw), out_dtype),
        grid=(g,),
        in_specs=in_specs,
        out_specs=pl.BlockSpec((1, nc, hw), lambda i: (i, 0, 0)),
        compiler_params=pltpu.CompilerParams(dimension_semantics=("parallel",)),
        cost_estimate=pl.CostEstimate(flops=flops, transcendentals=0,
                                      bytes_accessed=bytes_accessed),
    )(*inputs)

    return out_flat.reshape(b, 4, h, w)


# -----------------------------------------------------------------------------
# Pure-JAX reference (direct transcription of the PyTorch forward)
# -----------------------------------------------------------------------------
def torgb_reference(x, style, w_mod, b_mod, w_conv, b_conv, skip=None,
                    blur_kernel=(1, 3, 3, 1)):
    b, c, h, w = x.shape
    s_dim = style.shape[1]
    scale_mod = 1.0 / math.sqrt(s_dim)
    style_mod = jnp.dot(style, (w_mod * scale_mod).T,
                        precision=jax.lax.Precision.HIGHEST) + b_mod                 # EqualLinear
    scale_conv = 1.0 / math.sqrt(c * 1 * 1)
    weight = scale_conv * w_conv[None, :, :] * style_mod[:, None, :]                 # (B, 4, C)
    out = jnp.einsum('boc,bchw->bohw', weight, x,
                     precision=jax.lax.Precision.HIGHEST)                            # 1x1 grouped conv
    out = out + b_conv.reshape(1, 4, 1, 1)
    if skip is not None:
        k = jnp.asarray(blur_kernel, jnp.float32)
        k2 = jnp.outer(k, k)
        k2 = k2 / jnp.sum(k2) * 4.0                       # make_kernel(k) * factor**2
        kflip = jnp.flip(k2, (0, 1))
        cs = skip.shape[1]
        wk = jnp.tile(kflip[None, None, :, :], (cs, 1, 1, 1))      # depthwise (Cs,1,4,4)
        up = jax.lax.conv_general_dilated(
            skip.astype(jnp.float32), wk, window_strides=(1, 1),
            padding=((2, 2), (2, 2)), lhs_dilation=(2, 2),
            dimension_numbers=('NCHW', 'OIHW', 'NCHW'),
            feature_group_count=cs, precision=jax.lax.Precision.HIGHEST)
        out = out + up
    return out


if __name__ == "__main__":
    # Small shapes: B=2, in_channel=64, style_dim=64, spatial 16x16 (H*W = 256 -> lane-dense).
    B, C, S, H, W = 2, 64, 64, 16, 16
    key = jax.random.PRNGKey(0)
    kx, ks, kwm, kwc, kbc, ksk = jax.random.split(key, 6)

    x = jax.random.normal(kx, (B, C, H, W), dtype=jnp.float32)
    style = jax.random.normal(ks, (B, S), dtype=jnp.float32)
    skip = jax.random.normal(ksk, (B, 4, H // 2, W // 2), dtype=jnp.float32)

    # Parameters (shapes from the module's __init__; values random-but-deterministic).
    w_mod = jax.random.normal(kwm, (C, S), dtype=jnp.float32) * 0.1   # EqualLinear weight (C, S)
    b_mod = jnp.ones((C,), dtype=jnp.float32)                         # bias_init=1
    w_conv = jax.random.normal(kwc, (4, C), dtype=jnp.float32)        # conv weight (1,4,C,1,1)
    b_conv = jax.random.normal(kbc, (4,), dtype=jnp.float32) * 0.1    # ToRGB bias

    # With skip (exercises the separable Upsample path).
    out = jax.block_until_ready(
        torgb_pallas(x, style, w_mod, b_mod, w_conv, b_conv, skip=skip))
    ref = torgb_reference(x, style, w_mod, b_mod, w_conv, b_conv, skip=skip)
    assert out.shape == (B, 4, H, W)
    err = jnp.max(jnp.abs(out - ref))
    assert jnp.allclose(out, ref, rtol=5e-3, atol=5e-3), f"skip-path max abs err = {err}"

    # Without skip.
    out2 = jax.block_until_ready(
        torgb_pallas(x, style, w_mod, b_mod, w_conv, b_conv, skip=None))
    ref2 = torgb_reference(x, style, w_mod, b_mod, w_conv, b_conv, skip=None)
    err2 = jnp.max(jnp.abs(out2 - ref2))
    assert jnp.allclose(out2, ref2, rtol=5e-3, atol=5e-3), f"no-skip max abs err = {err2}"

    print("KERNEL_OK")
</pallas_src>

<mosaic_0001>
module attributes {stable_mosaic.version = 11 : i64} {
  func.func @_torgb_kernel(%arg0: i32, %arg1: memref<1x128x256xf32, #tpu.memory_space<vmem>>, %arg2: memref<1x2x64xf32, #tpu.memory_space<vmem>>, %arg3: memref<64x64xf32, #tpu.memory_space<vmem>>, %arg4: memref<1x64xf32, #tpu.memory_space<vmem>>, %arg5: memref<4x64xf32, #tpu.memory_space<vmem>>, %arg6: memref<8x1xf32, #tpu.memory_space<vmem>>, %arg7: memref<1x64x8xf32, #tpu.memory_space<vmem>>, %arg8: memref<16x8xf32, #tpu.memory_space<vmem>>, %arg9: memref<8x16xf32, #tpu.memory_space<vmem>>, %arg10: memref<1x8x256xf32, #tpu.memory_space<vmem>>) attributes {dimension_semantics = [#tpu.dimension_semantics<parallel>], iteration_bounds = array<i64: 1>, scalar_prefetch = 0 : i64, scratch_operands = 0 : i64, tpu.core_type = #tpu.core_type<tc>, window_params = [{transform_indices = @transform_0, window_bounds = array<i64: 1, 128, 256>}, {transform_indices = @transform_1, window_bounds = array<i64: 1, 2, 64>}, {pipeline_mode = #tpu.pipeline_mode<synchronous>, transform_indices = @transform_2, window_bounds = array<i64: 64, 64>}, {pipeline_mode = #tpu.pipeline_mode<synchronous>, transform_indices = @transform_3, window_bounds = array<i64: 1, 64>}, {pipeline_mode = #tpu.pipeline_mode<synchronous>, transform_indices = @transform_4, window_bounds = array<i64: 4, 64>}, {pipeline_mode = #tpu.pipeline_mode<synchronous>, transform_indices = @transform_5, window_bounds = array<i64: 8, 1>}, {transform_indices = @transform_6, window_bounds = array<i64: 1, 64, 8>}, {pipeline_mode = #tpu.pipeline_mode<synchronous>, transform_indices = @transform_7, window_bounds = array<i64: 16, 8>}, {pipeline_mode = #tpu.pipeline_mode<synchronous>, transform_indices = @transform_8, window_bounds = array<i64: 8, 16>}, {transform_indices = @transform_9, window_bounds = array<i64: 1, 8, 256>}]} {
    %c0 = arith.constant 0 : index
    %c0_0 = arith.constant 0 : index
    %c0_1 = arith.constant 0 : index
    %0 = vector.load %arg1[%c0, %c0_0, %c0_1] : memref<1x128x256xf32, #tpu.memory_space<vmem>>, vector<1x128x256xf32>
    %1 = vector.shape_cast %0 : vector<1x128x256xf32> to vector<128x256xf32>
    %c0_2 = arith.constant 0 : index
    %c0_3 = arith.constant 0 : index
    %c0_4 = arith.constant 0 : index
    %2 = vector.load %arg2[%c0_2, %c0_3, %c0_4] : memref<1x2x64xf32, #tpu.memory_space<vmem>>, vector<1x2x64xf32>
    %3 = vector.shape_cast %2 : vector<1x2x64xf32> to vector<2x64xf32>
    %c0_5 = arith.constant 0 : index
    %c0_6 = arith.constant 0 : index
    %4 = vector.load %arg3[%c0_5, %c0_6] : memref<64x64xf32, #tpu.memory_space<vmem>>, vector<64x64xf32>
    %cst = arith.constant dense<0.000000e+00> : vector<2x64xf32>
    %5 = tpu.matmul %3, %4, %cst {dimension_numbers = #tpu.dot_dimension_numbers<[1], [0], [0], [1], [0, 0, 1, 1], [], []>} : vector<2x64xf32>, vector<64x64xf32>, vector<2x64xf32> -> vector<2x64xf32>
    %cst_7 = arith.constant 1.250000e-01 : f32
    %6 = vector.broadcast %cst_7 : f32 to vector<2x64xf32>
    %7 = arith.mulf %6, %5 : vector<2x64xf32>
    %c0_8 = arith.constant 0 : index
    %c0_9 = arith.constant 0 : index
    %8 = vector.load %arg4[%c0_8, %c0_9] : memref<1x64xf32, #tpu.memory_space<vmem>>, vector<1x64xf32>
    %9 = vector.broadcast %8 : vector<1x64xf32> to vector<2x64xf32>
    %10 = arith.addf %7, %9 : vector<2x64xf32>
    %c0_10 = arith.constant 0 : index
    %c0_11 = arith.constant 0 : index
    %11 = vector.load %arg5[%c0_10, %c0_11] : memref<4x64xf32, #tpu.memory_space<vmem>>, vector<4x64xf32>
    %cst_12 = arith.constant 1.250000e-01 : f32
    %12 = vector.broadcast %cst_12 : f32 to vector<4x64xf32>
    %13 = arith.mulf %12, %11 : vector<4x64xf32>
    %14 = vector.extract_strided_slice %10 {offsets = [0, 0], sizes = [1, 64], strides = [1, 1]} : vector<2x64xf32> to vector<1x64xf32>
    %15 = vector.broadcast %14 : vector<1x64xf32> to vector<4x64xf32>
    %16 = arith.mulf %13, %15 : vector<4x64xf32>
    %cst_13 = arith.constant 0.000000e+00 : f32
    %17 = vector.broadcast %cst_13 : f32 to vector<4x64xf32>
    %18 = tpu.concatenate %16, %17 in 1 : vector<4x64xf32>, vector<4x64xf32> -> vector<4x128xf32>
    %19 = vector.extract_strided_slice %10 {offsets = [1, 0], sizes = [1, 64], strides = [1, 1]} : vector<2x64xf32> to vector<1x64xf32>
    %20 = vector.broadcast %19 : vector<1x64xf32> to vector<4x64xf32>
    %21 = arith.mulf %13, %20 : vector<4x64xf32>
    %cst_14 = arith.constant 0.000000e+00 : f32
    %22 = vector.broadcast %cst_14 : f32 to vector<4x64xf32>
    %23 = tpu.concatenate %22, %21 in 1 : vector<4x64xf32>, vector<4x64xf32> -> vector<4x128xf32>
    %24 = tpu.concatenate %18, %23 in 0 : vector<4x128xf32>, vector<4x128xf32> -> vector<8x128xf32>
    %cst_15 = arith.constant dense<0.000000e+00> : vector<8x256xf32>
    %25 = tpu.matmul %24, %1, %cst_15 {dimension_numbers = #tpu.dot_dimension_numbers<[1], [0], [0], [1], [0, 0, 1, 1], [], []>} : vector<8x128xf32>, vector<128x256xf32>, vector<8x256xf32> -> vector<8x256xf32>
    %c0_16 = arith.constant 0 : index
    %c0_17 = arith.constant 0 : index
    %26 = vector.load %arg6[%c0_16, %c0_17] : memref<8x1xf32, #tpu.memory_space<vmem>>, vector<8x1xf32>
    %27 = vector.broadcast %26 : vector<8x1xf32> to vector<8x256xf32>
    %28 = arith.addf %25, %27 : vector<8x256xf32>
    %c0_18 = arith.constant 0 : index
    %c0_19 = arith.constant 0 : index
    %c0_20 = arith.constant 0 : index
    %29 = vector.load %arg7[%c0_18, %c0_19, %c0_20] : memref<1x64x8xf32, #tpu.memory_space<vmem>>, vector<1x64x8xf32>
    %30 = vector.shape_cast %29 : vector<1x64x8xf32> to vector<64x8xf32>
    %c0_21 = arith.constant 0 : index
    %c0_22 = arith.constant 0 : index
    %31 = vector.load %arg9[%c0_21, %c0_22] : memref<8x16xf32, #tpu.memory_space<vmem>>, vector<8x16xf32>
    %cst_23 = arith.constant dense<0.000000e+00> : vector<64x16xf32>
    %32 = tpu.matmul %30, %31, %cst_23 {dimension_numbers = #tpu.dot_dimension_numbers<[1], [0], [0], [1], [0, 0, 1, 1], [], []>} : vector<64x8xf32>, vector<8x16xf32>, vector<64x16xf32> -> vector<64x16xf32>
    %33 = vector.shape_cast %32 : vector<64x16xf32> to vector<8x8x16xf32>
    %c0_24 = arith.constant 0 : index
    %c0_25 = arith.constant 0 : index
    %34 = vector.load %arg8[%c0_24, %c0_25] : memref<16x8xf32, #tpu.memory_space<vmem>>, vector<16x8xf32>
    %35 = vector.shape_cast %34 : vector<16x8xf32> to vector<1x16x8xf32>
    %36 = vector.shape_cast %35 : vector<1x16x8xf32> to vector<1x16x8xf32>
    %37 = vector.broadcast %36 : vector<1x16x8xf32> to vector<8x16x8xf32>
    %cst_26 = arith.constant dense<0.000000e+00> : vector<8x16x16xf32>
    %38 = tpu.matmul %37, %33, %cst_26 {dimension_numbers = #tpu.dot_dimension_numbers<[2], [1], [1], [2], [0, 0, 0, 1, 1, 2], [0], [0]>} : vector<8x16x8xf32>, vector<8x8x16xf32>, vector<8x16x16xf32> -> vector<8x16x16xf32>
    %39 = vector.extract_strided_slice %38 {offsets = [0, 0, 0], sizes = [8, 1, 16], strides = [1, 1, 1]} : vector<8x16x16xf32> to vector<8x1x16xf32>
    %40 = vector.shape_cast %39 : vector<8x1x16xf32> to vector<8x16xf32>
    %41 = vector.extract_strided_slice %38 {offsets = [0, 1, 0], sizes = [8, 1, 16], strides = [1, 1, 1]} : vector<8x16x16xf32> to vector<8x1x16xf32>
    %42 = vector.shape_cast %41 : vector<8x1x16xf32> to vector<8x16xf32>
    %43 = vector.extract_strided_slice %38 {offsets = [0, 2, 0], sizes = [8, 1, 16], strides = [1, 1, 1]} : vector<8x16x16xf32> to vector<8x1x16xf32>
    %44 = vector.shape_cast %43 : vector<8x1x16xf32> to vector<8x16xf32>
    %45 = vector.extract_strided_slice %38 {offsets = [0, 3, 0], sizes = [8, 1, 16], strides = [1, 1, 1]} : vector<8x16x16xf32> to vector<8x1x16xf32>
    %46 = vector.shape_cast %45 : vector<8x1x16xf32> to vector<8x16xf32>
    %47 = vector.extract_strided_slice %38 {offsets = [0, 4, 0], sizes = [8, 1, 16], strides = [1, 1, 1]} : vector<8x16x16xf32> to vector<8x1x16xf32>
    %48 = vector.shape_cast %47 : vector<8x1x16xf32> to vector<8x16xf32>
    %49 = vector.extract_strided_slice %38 {offsets = [0, 5, 0], sizes = [8, 1, 16], strides = [1, 1, 1]} : vector<8x16x16xf32> to vector<8x1x16xf32>
    %50 = vector.shape_cast %49 : vector<8x1x16xf32> to vector<8x16xf32>
    %51 = vector.extract_strided_slice %38 {offsets = [0, 6, 0], sizes = [8, 1, 16], strides = [1, 1, 1]} : vector<8x16x16xf32> to vector<8x1x16xf32>
    %52 = vector.shape_cast %51 : vector<8x1x16xf32> to vector<8x16xf32>
    %53 = vector.extract_strided_slice %38 {offsets = [0, 7, 0], sizes = [8, 1, 16], strides = [1, 1, 1]} : vector<8x16x16xf32> to vector<8x1x16xf32>
    %54 = vector.shape_cast %53 : vector<8x1x16xf32> to vector<8x16xf32>
    %55 = vector.extract_strided_slice %38 {offsets = [0, 8, 0], sizes = [8, 1, 16], strides = [1, 1, 1]} : vector<8x16x16xf32> to vector<8x1x16xf32>
    %56 = vector.shape_cast %55 : vector<8x1x16xf32> to vector<8x16xf32>
    %57 = vector.extract_strided_slice %38 {offsets = [0, 9, 0], sizes = [8, 1, 16], strides = [1, 1, 1]} : vector<8x16x16xf32> to vector<8x1x16xf32>
    %58 = vector.shape_cast %57 : vector<8x1x16xf32> to vector<8x16xf32>
    %59 = vector.extract_strided_slice %38 {offsets = [0, 10, 0], sizes = [8, 1, 16], strides = [1, 1, 1]} : vector<8x16x16xf32> to vector<8x1x16xf32>
    %60 = vector.shape_cast %59 : vector<8x1x16xf32> to vector<8x16xf32>
    %61 = vector.extract_strided_slice %38 {offsets = [0, 11, 0], sizes = [8, 1, 16], strides = [1, 1, 1]} : vector<8x16x16xf32> to vector<8x1x16xf32>
    %62 = vector.shape_cast %61 : vector<8x1x16xf32> to vector<8x16xf32>
    %63 = vector.extract_strided_slice %38 {offsets = [0, 12, 0], sizes = [8, 1, 16], strides = [1, 1, 1]} : vector<8x16x16xf32> to vector<8x1x16xf32>
    %64 = vector.shape_cast %63 : vector<8x1x16xf32> to vector<8x16xf32>
    %65 = vector.extract_strided_slice %38 {offsets = [0, 13, 0], sizes = [8, 1, 16], strides = [1, 1, 1]} : vector<8x16x16xf32> to vector<8x1x16xf32>
    %66 = vector.shape_cast %65 : vector<8x1x16xf32> to vector<8x16xf32>
    %67 = vector.extract_strided_slice %38 {offsets = [0, 14, 0], sizes = [8, 1, 16], strides = [1, 1, 1]} : vector<8x16x16xf32> to vector<8x1x16xf32>
    %68 = vector.shape_cast %67 : vector<8x1x16xf32> to vector<8x16xf32>
    %69 = vector.extract_strided_slice %38 {offsets = [0, 15, 0], sizes = [8, 1, 16], strides = [1, 1, 1]} : vector<8x16x16xf32> to vector<8x1x16xf32>
    %70 = vector.shape_cast %69 : vector<8x1x16xf32> to vector<8x16xf32>
    %71 = tpu.concatenate %40, %42, %44, %46, %48, %50, %52, %54, %56, %58, %60, %62, %64, %66, %68, %70 in 1 : vector<8x16xf32>, vector<8x16xf32>, vector<8x16xf32>, vector<8x16xf32>, vector<8x16xf32>, vector<8x16xf32>, vector<8x16xf32>, vector<8x16xf32>, vector<8x16xf32>, vector<8x16xf32>, vector<8x16xf32>, vector<8x16xf32>, vector<8x16xf32>, vector<8x16xf32>, vector<8x16xf32>, vector<8x16xf32> -> vector<8x256xf32>
    %72 = arith.addf %28, %71 : vector<8x256xf32>
    %c0_27 = arith.constant 0 : index
    %c0_28 = arith.constant 0 : index
    %c0_29 = arith.constant 0 : index
    %73 = vector.load %arg10[%c0_27, %c0_28, %c0_29] : memref<1x8x256xf32, #tpu.memory_space<vmem>>, vector<1x8x256xf32>
    %74 = vector.shape_cast %73 : vector<1x8x256xf32> to vector<8x256xf32>
    %75 = vector.shape_cast %72 : vector<8x256xf32> to vector<1x8x256xf32>
    tpu.vector_store %arg10[%c0_27, %c0_28, %c0_29], %75 {strides = array<i32>} : memref<1x8x256xf32, #tpu.memory_space<vmem>>, vector<1x8x256xf32>,
    return
  }
  func.func @transform_0(%arg0: i32) -> (i32, i32, i32) {
    %c0_i32 = arith.constant 0 : i32
    %c0_i32_0 = arith.constant 0 : i32
    %c0_i32_1 = arith.constant 0 : i32
    return %arg0, %c0_i32, %c0_i32_0 : i32, i32, i32
  }
  func.func @transform_1(%arg0: i32) -> (i32, i32, i32) {
    %c0_i32 = arith.constant 0 : i32
    %c0_i32_0 = arith.constant 0 : i32
    %c0_i32_1 = arith.constant 0 : i32
    return %arg0, %c0_i32, %c0_i32_0 : i32, i32, i32
  }
  func.func @transform_2(%arg0: i32) -> (i32, i32) {
    %c0_i32 = arith.constant 0 : i32
    %c0_i32_0 = arith.constant 0 : i32
    %c0_i32_1 = arith.constant 0 : i32
    return %c0_i32, %c0_i32_0 : i32, i32
  }
  func.func @transform_3(%arg0: i32) -> (i32, i32) {
    %c0_i32 = arith.constant 0 : i32
    %c0_i32_0 = arith.constant 0 : i32
    %c0_i32_1 = arith.constant 0 : i32
    return %c0_i32, %c0_i32_0 : i32, i32
  }
  func.func @transform_4(%arg0: i32) -> (i32, i32) {
    %c0_i32 = arith.constant 0 : i32
    %c0_i32_0 = arith.constant 0 : i32
    %c0_i32_1 = arith.constant 0 : i32
    return %c0_i32, %c0_i32_0 : i32, i32
  }
  func.func @transform_5(%arg0: i32) -> (i32, i32) {
    %c0_i32 = arith.constant 0 : i32
    %c0_i32_0 = arith.constant 0 : i32
    %c0_i32_1 = arith.constant 0 : i32
    return %c0_i32, %c0_i32_0 : i32, i32
  }
  func.func @transform_6(%arg0: i32) -> (i32, i32, i32) {
    %c0_i32 = arith.constant 0 : i32
    %c0_i32_0 = arith.constant 0 : i32
    %c0_i32_1 = arith.constant 0 : i32
    return %arg0, %c0_i32, %c0_i32_0 : i32, i32, i32
  }
  func.func @transform_7(%arg0: i32) -> (i32, i32) {
    %c0_i32 = arith.constant 0 : i32
    %c0_i32_0 = arith.constant 0 : i32
    %c0_i32_1 = arith.constant 0 : i32
    return %c0_i32, %c0_i32_0 : i32, i32
  }
  func.func @transform_8(%arg0: i32) -> (i32, i32) {
    %c0_i32 = arith.constant 0 : i32
    %c0_i32_0 = arith.constant 0 : i32
    %c0_i32_1 = arith.constant 0 : i32
    return %c0_i32, %c0_i32_0 : i32, i32
  }
  func.func @transform_9(%arg0: i32) -> (i32, i32, i32) {
    %c0_i32 = arith.constant 0 : i32
    %c0_i32_0 = arith.constant 0 : i32
    %c0_i32_1 = arith.constant 0 : i32
    return %arg0, %c0_i32, %c0_i32_0 : i32, i32, i32
  }
}

</mosaic_0001>

<bundles_post_ra>
// kernel: tpu_custom_call.1
= control target key start
LH: loop header
LB: loop body
LE: loop exit
PB: predicated region body
PF: predicated region fallthrough
CT: control target
= control target key end

     0   :  { %14 = vsyncpa [#allocation3], 0  ;;  %s2138_s0 = inlined_call_operand.hbm [shape: f32[1,128,256], index: 0, kind: input, shape index: {}]   ;;  %s2139_s1 = inlined_call_operand.vmem [shape: f32[1,2,64], index: 1, kind: input, shape index: {}]   ;;  %s2140_s2 = inlined_call_operand.vmem [shape: f32[64,64], index: 2, kind: input, shape index: {}]   ;;  %s2141_s3 = inlined_call_operand.vmem [shape: f32[1,64], index: 3, kind: input, shape index: {}]   ;;  %s2142_s4 = inlined_call_operand.vmem [shape: f32[4,64], index: 4, kind: input, shape index: {}]   ;;  %s2143_s5 = inlined_call_operand.vmem [shape: f32[8,1], index: 5, kind: input, shape index: {}]   ;;  %s2144_s6 = inlined_call_operand.vmem [shape: f32[1,64,8], index: 6, kind: input, shape index: {}]   ;;  %s2145_s7 = inlined_call_operand.vmem [shape: f32[16,8], index: 7, kind: input, shape index: {}]   ;;  %s2146_s8 = inlined_call_operand.vmem [shape: f32[8,16], index: 8, kind: input, shape index: {}]   ;;  %s2147_s9 = inlined_call_operand.hbm [shape: f32[1,8,256], index: 9, kind: output, shape index: {}]  }
   0x1   :  { %15 = vsyncpa [#allocation4], 0  ;;  %s1547_s30 = smov [#allocation2]  }
   0x2   :  { %s21_s10 = sshll.u32 %s1547_s30, 4  ;;  %s22_s10 = int_to_ptr.vmem [resolvable:$true] %s21_s10 }
   0x3   :  { %s1511_s11 = scalar_lea.vmem %s22_s10, 4096  ;;  %p1516_p1 = scmp.lt.s32.totalorder %s22_s10, %s22_s10 }
   0x4   :  { %p1512_p0 = scmp.ne.s32.totalorder %s22_s10, %s1511_s11  ;;  %p1517_p2 = scmp.lt.s32.totalorder %s1511_s11, %s1511_s11 }
   0x6   :  { %p1518_p3 = por %p1517_p2, %p1516_p1 }
   0x8   :  { %p1519_p4 = pnand %p1518_p3, %p1512_p0 }
   0xa   :  { %1522 = shalt.err (!%p1519_p4)
}
   0xb   :  { %s1548_s12 = smov 256   ;;  %s1549_s13 = smov 16  }
   0xc   :  { %27 = dma.hbm_to_vmem [thread:$0]  %s2138_s0, 4096, %s22_s10, [#allocation3], %s1548_s12, %s1548_s12, %s1549_s13  }
   0xd   :  { %1543 = dma.done.wait [#allocation3], 4096  }
   0xe   :  { %1544 = vsyncadd [#allocation3], 4294963200  ;;  %v1550_v0 = vmov 0.0   ;;  %vm1551_vm0 = vmmov 0   ;;  %v87_v1 = vld [vmem:[%s2140_s2 + $0x38] sm:$0xff]  ;;  %v86_v2 = vld [vmem:[%s2140_s2 + $0x30] sm:$0xff]  ;;  %v173_v51 = vlaneseq }
   0xf   :  { %1416 = vmatprep.subr.mxu0 %v1550_v0  ;;  %1432 = vmatprep.mubr.msk.f32.mxu0 %vm1551_vm0, %v1550_v0  ;;  %v85_v3 = vld [vmem:[%s2140_s2 + $0x28] sm:$0xff]  ;;  %v84_v4 = vld [vmem:[%s2140_s2 + $0x20] sm:$0xff]  ;;  %v83_v5 = vld [vmem:[%s2140_s2 + $0x18] sm:$0xff]  ;;  %vm88_vm1 = vcmask 523264   ;;  %vm280_vm2 = vcmask 64512   ;;  %vm192_vm3 = vcmask 1043456  }
  0x10   :  { %264 = vmatprep.mubr.f32.mxu1 %v1550_v0  ;;  %1417 = vmatpush3.msra.mxu0 %v87_v1  ;;  %v82_v6 = vld [vmem:[%s2140_s2 + $0x10] sm:$0xff]  ;;  %v81_v7 = vld [vmem:[%s2140_s2 + $0x8] sm:$0xff]  ;;  %v80_v8 = vld [vmem:[%s2140_s2] sm:$0xff]  ;;  %v174_v52 = vshrl.u32 %v173_v51, 7  ;;  %vm1027_vm4 = vcmask 1041409   ;;  %vm1030_vm5 = vcmask 1042434  }
  0x11   :  { %1418 = vmatprep.subr.mxu0 %v1550_v0  ;;  %v79_v9 = vld [vmem:[%s2139_s1] sm:$0x3]  ;;  %v272_v12 = vld [vmem:[%s2144_s6 + $0x8] sm:$0xff]  ;;  %v273_v13 = vld [vmem:[%s2144_s6 + $0x10] sm:$0xff]  ;;  %vm1033_vm6 = vcmask 1043459   ;;  %vm1036_vm7 = vcmask 1044484  }
  0x12   :  { %1419 = vmatpush3.msra.mxu0 %v86_v2  ;;  %v279_v10 = vld [vmem:[%s2146_s8] sm:$0xff]  ;;  %v274_v14 = vld [vmem:[%s2144_s6 + $0x18] sm:$0xff]  ;;  %v276_v16 = vld [vmem:[%s2144_s6 + $0x28] sm:$0xff]  ;;  %v175_v58 = vsub.s32 0, %v174_v52  ;;  %v181_v59 = vsub.s32 1, %v174_v52  ;;  %vm1039_vm8 = vcmask 1045509  }
  0x13   :  { %1420 = vmatprep.subr.mxu0 %v1550_v0  ;;  %v271_v11 = vld [vmem:[%s2144_s6] sm:$0xff]  ;;  %v277_v17 = vld [vmem:[%s2144_s6 + $0x30] sm:$0xff]  ;;  %v278_v18 = vld [vmem:[%s2144_s6 + $0x38] sm:$0xff]  ;;  %vm1042_vm9 = vcmask 1046534   ;;  %vm1045_vm10 = vcmask 1047559   ;;  %s1555_s14 = smov 48  }
  0x14   :  { %1421 = vmatpush3.msra.mxu0 %v85_v3  ;;  %v275_v15 = vld [vmem:[%s2144_s6 + $0x20] sm:$0xff]  ;;  %v78_v19 = vld [vmem:[#allocation2 + $0xf8] sm:$0xff]  ;;  %v77_v20 = vld [vmem:[#allocation2 + $0xf0] sm:$0xff]  ;;  %s1557_s15 = smov 96   ;;  %s1558_s16 = smov 112   ;;  %vm1309_vm11 = vcmask 130048  }
  0x15   :  { %1422 = vmatprep.subr.mxu0 %v1550_v0  ;;  %v76_v21 = vld [vmem:[#allocation2 + $0xe8] sm:$0xff]  ;;  %200 = vmatprep.subr.mxu1 %v78_v19  ;;  %v75_v22 = vld [vmem:[#allocation2 + $0xe0] sm:$0xff]  ;;  %v74_v23 = vld [vmem:[#allocation2 + $0xd8] sm:$0xff]  ;;  %vm1311_vm12 = vcmask 261120   ;;  %vm1313_vm13 = vcmask 392192   ;;  %vm1316_vm14 = vcmask 654336  }
  0x16   :  { %1423 = vmatpush3.msra.mxu0 %v84_v4  ;;  %201 = vmatpush1.msra.mxu1 %v77_v20  ;;  %v73_v24 = vld [vmem:[#allocation2 + $0xd0] sm:$0xff]  ;;  %v72_v25 = vld [vmem:[#allocation2 + $0xc8] sm:$0xff]  ;;  %v71_v26 = vld [vmem:[#allocation2 + $0xc0] sm:$0xff]  ;;  %vm1318_vm15 = vcmask 785408   ;;  %vm1320_vm0 = vcmask 916480   ;;  %s1559_s2 = smov [#allocation5]  }
  0x17   :  { %1424 = vmatprep.subr.mxu0 %v1550_v0  ;;  %202 = vmatprep.subr.mxu1 %v76_v21  ;;  %v70_v27 = vld [vmem:[#allocation2 + $0xb8] sm:$0xff]  ;;  %v69_v28 = vld [vmem:[#allocation2 + $0xb0] sm:$0xff]  ;;  %v68_v29 = vld [vmem:[#allocation2 + $0xa8] sm:$0xff]  ;;  %s1339_s1 = sshll.u32 %s1559_s2, 4  ;;  %s1340_s1 = int_to_ptr.vmem [resolvable:$true] %s1339_s1 }
  0x18   :  { %1425 = vmatpush3.msra.mxu0 %v83_v5  ;;  %203 = vmatpush1.msra.mxu1 %v75_v22  ;;  %v67_v30 = vld [vmem:[#allocation2 + $0xa0] sm:$0xff]  ;;  %v66_v31 = vld [vmem:[#allocation2 + $0x98] sm:$0xff]  ;;  %v65_v32 = vld [vmem:[#allocation2 + $0x90] sm:$0xff]  ;;  %s1523_s17 = scalar_lea.vmem %s1340_s1, 256  ;;  %p1528_p6 = scmp.lt.s32.totalorder %s1340_s1, %s1340_s1 }
  0x19   :  { %1426 = vmatprep.subr.mxu0 %v1550_v0  ;;  %204 = vmatprep.subr.mxu1 %v74_v23  ;;  %v64_v33 = vld [vmem:[#allocation2 + $0x88] sm:$0xff]  ;;  %v63_v34 = vld [vmem:[#allocation2 + $0x80] sm:$0xff]  ;;  %v62_v35 = vld [vmem:[#allocation2 + $0x78] sm:$0xff]  ;;  %p1524_p5 = scmp.ne.s32.totalorder %s1340_s1, %s1523_s17  ;;  %p1529_p7 = scmp.lt.s32.totalorder %s1523_s17, %s1523_s17 }
  0x1a   :  { %1427 = vmatpush3.msra.mxu0 %v82_v6  ;;  %205 = vmatpush1.msra.mxu1 %v73_v24  ;;  %v61_v36 = vld [vmem:[#allocation2 + $0x70] sm:$0xff]  ;;  %v60_v37 = vld [vmem:[#allocation2 + $0x68] sm:$0xff]  ;;  %v59_v38 = vld [vmem:[#allocation2 + $0x60] sm:$0xff] }
  0x1b   :  { %1428 = vmatprep.subr.mxu0 %v1550_v0  ;;  %206 = vmatprep.subr.mxu1 %v72_v25  ;;  %v58_v39 = vld [vmem:[#allocation2 + $0x58] sm:$0xff]  ;;  %v57_v40 = vld [vmem:[#allocation2 + $0x50] sm:$0xff]  ;;  %v56_v41 = vld [vmem:[#allocation2 + $0x48] sm:$0xff]  ;;  %p1530_p8 = por %p1529_p7, %p1528_p6 }
  0x1c   :  { %1429 = vmatpush3.msra.mxu0 %v81_v7  ;;  %207 = vmatpush1.msra.mxu1 %v71_v26  ;;  %v55_v42 = vld [vmem:[#allocation2 + $0x40] sm:$0xff]  ;;  %v54_v43 = vld [vmem:[#allocation2 + $0x38] sm:$0xff]  ;;  %v53_v44 = vld [vmem:[#allocation2 + $0x30] sm:$0xff] }
  0x1d   :  { %1430 = vmatprep.subr.mxu0 %v1550_v0  ;;  %208 = vmatprep.subr.mxu1 %v70_v27  ;;  %v52_v45 = vld [vmem:[#allocation2 + $0x28] sm:$0xff]  ;;  %v51_v46 = vld [vmem:[#allocation2 + $0x20] sm:$0xff]  ;;  %v50_v47 = vld [vmem:[#allocation2 + $0x18] sm:$0xff]  ;;  %p1531_p9 = pnand %p1530_p8, %p1524_p5 }
  0x1e   :  { %1431 = vmatpush3.msra.mxu0 %v80_v8  ;;  %209 = vmatpush1.msra.mxu1 %v69_v28  ;;  %v49_v48 = vld [vmem:[#allocation2 + $0x10] sm:$0xff]  ;;  %v48_v49 = vld [vmem:[#allocation2 + $0x8] sm:$0xff]  ;;  %v47_v50 = vld [vmem:[#allocation2] sm:$0xff] }
  0x1f   :  { %1433 = vmatmul.mubr.msk.f32.vlgmr.msra.gmra.mxu0 %vm88_vm1, %v79_v9  ;;  %1435 = vmatprep.subr.mxu0 %v279_v10  ;;  %v1680_v53 = vld [vmem:[%s2145_s7] sm:$0xff]  ;;  %v411_v3 = vld [vmem:[%s2145_s7 + $0x8] sm:$0xff] }
  0x20   :  { %1436 = vmatpush3.msra.mxu0 %v279_v10  ;;  %1437 = vmatprep.mubr.msk.f32.mxu0 %vm280_vm2, %v271_v11  ;;  %v1349_v55 = vld [vmem:[%s2141_s3] ss:$0 sm:$0xff]  ;;  %s1552_s3 = smov 64  }
  0x21   :  { %210 = vmatprep.subr.mxu1 %v68_v29  ;;  %v171_v56 = vld [vmem:[%s2142_s4] sm:$0xf] }
  0x22   :  { %211 = vmatpush1.msra.mxu1 %v67_v30  ;;  %v172_v62 = vmul.f32 0.125, %v171_v56  ;;  %v194_v11 = vld [vmem:[%s2143_s5] sm:$0xff]  ;;  %s1554_s5 = smov 32  }
  0x23   :  { %1438 = vmatmul.mubr.msk.f32.vlgmr.msra.gmra.mxu0 %vm280_vm2, %v272_v12  ;;  %212 = vmatprep.subr.mxu1 %v66_v31  ;;  %v1553_v12 = vmov 0  }
  0x24   :  { %1440 = vmatprep.mubr.msk.f32.mxu0 %vm280_vm2, %v273_v13  ;;  %213 = vmatpush1.msra.mxu1 %v65_v32 }
  0x25   :  { %214 = vmatprep.subr.mxu1 %v64_v33  ;;  %1502 = vset.pattern.permute.xlu0 %v1553_v12 }
  0x26   :  { %215 = vmatpush1.msra.mxu1 %v63_v34 }
  0x27   :  { %1441 = vmatmul.mubr.msk.f32.gmra.mxu0 %vm280_vm2, %v274_v14  ;;  %216 = vmatprep.subr.mxu1 %v62_v35 }
  0x28   :  { %1443 = vmatprep.mubr.msk.f32.mxu0 %vm280_vm2, %v275_v15  ;;  %217 = vmatpush1.msra.mxu1 %v61_v36 }
  0x29   :  { %218 = vmatprep.subr.mxu1 %v60_v37 }
  0x2a   :  { %219 = vmatpush1.msra.mxu1 %v59_v38 }
  0x2b   :  { %1444 = vmatmul.mubr.msk.f32.gmra.mxu0 %vm280_vm2, %v276_v16  ;;  %220 = vmatprep.subr.mxu1 %v58_v39 }
  0x2c   :  { %1446 = vmatprep.mubr.msk.f32.mxu0 %vm280_vm2, %v277_v17  ;;  %221 = vmatpush1.msra.mxu1 %v57_v40 }
  0x2d   :  { %222 = vmatprep.subr.mxu1 %v56_v41 }
  0x2e   :  { %223 = vmatpush1.msra.mxu1 %v55_v42 }
  0x2f   :  { %1447 = vmatmul.mubr.msk.f32.gmra.mxu0 %vm280_vm2, %v278_v18  ;;  %224 = vmatprep.subr.mxu1 %v54_v43 }
  0x30   :  { %225 = vmatpush1.msra.mxu1 %v53_v44  ;;  %1451 = vmatprep.mubr.msk.f32.mxu0 %vm280_vm2, %v1680_v53 }
  0x31   :  { %226 = vmatprep.subr.mxu1 %v52_v45 }
  0x32   :  { %227 = vmatpush1.msra.mxu1 %v51_v46 }
  0x33   :  { %228 = vmatprep.subr.mxu1 %v50_v47 }
  0x34   :  { %229 = vmatpush1.msra.mxu1 %v49_v48 }
  0x35   :  { %230 = vmatprep.subr.mxu1 %v48_v49 }
  0x36   :  { %231 = vmatpush1.msra.mxu1 %v47_v50 }
  0xdf   :  { %v158_v54 = vpop.f32.mrf.mxu0 }
  0xe0   :  { %v162_v57 = vmul.f32 0.125, %v158_v54 }
  0xe1   :  { %v1434_v60 = vpop.f32.mrf.mxu0 }
  0xe2   :  { %v170_v61 = vadd.f32 %v1349_v55, %v162_v57 }
  0xe3   :  { %v1439_v63 = vpop.f32.mrf.mxu0 }
  0xe4   :  { %v176_v0 = vrot.slane %v170_v61, %v175_v58  ;;  %v182_v1 = vrot.slane %v170_v61, %v181_v59  ;;  %1454 = vmatprep.subr.mxu1 %v1439_v63 }
  0xe5   :  { %v371_v2 = vpop.f32.mrf.mxu0 }
  0xe6   :  { %v183_v4 = vmul.f32 %v182_v1, %v172_v62  ;;  %v177_v5 = vmul.f32 %v176_v0, %v172_v62  ;;  %1449 = vmatprep.subr.mxu0 %v371_v2 }
  0xe7   :  { %1450 = vmatpush3.msra.mxu0 %v371_v2  ;;  %v1442_v6 = vpop.f32.mrf.mxu0 }
  0xe8   :  { %185 = vrot.lane.b32.xlu0 %v183_v4, %s1552_s3  ;;  %1452 = vmatmul.mubr.msk.f32.vlgmr.msra.gmra.mxu0 %vm280_vm2, %v411_v3  ;;  %v178_v17 = vsel %vm88_vm1, %v177_v5, 0.0 }
  0xe9   :  { %v381_v7 = vpop.f32.mrf.mxu0  ;;  %1461 = vmatprep.mubr.msk.f32.mxu0 %vm280_vm2, %v1680_v53 }
  0xea   :  { %1459 = vmatprep.subr.mxu0 %v381_v7 }
  0xeb   :  { %v1445_v8 = vpop.f32.mrf.mxu0  ;;  %1460 = vmatpush3.msra.mxu0 %v381_v7 }
  0xec   :  { %1462 = vmatmul.mubr.msk.f32.vlgmr.msra.gmra.mxu0 %vm280_vm2, %v411_v3  ;;  %197 = vperm.xlu0 %1502, %v194_v11  }
  0xed   :  { %v391_v9 = vpop.f32.mrf.mxu0  ;;  %1471 = vmatprep.mubr.msk.f32.mxu0 %vm280_vm2, %v1680_v53 }
  0xee   :  { %1469 = vmatprep.subr.mxu0 %v391_v9 }
  0xef   :  { %v1448_v10 = vpop.f32.mrf.mxu0  ;;  %1470 = vmatpush3.msra.mxu0 %v391_v9 }
  0xf0   :  { %1472 = vmatmul.mubr.msk.f32.vlgmr.msra.gmra.mxu0 %vm280_vm2, %v411_v3 }
  0xf1   :  { %v401_v13 = vpop.f32.mrf.mxu0  ;;  %1481 = vmatprep.mubr.msk.f32.mxu0 %vm280_vm2, %v1680_v53 }
  0xf2   :  { %1479 = vmatprep.subr.mxu0 %v401_v13 }
  0xf3   :  { %1480 = vmatpush3.msra.mxu0 %v401_v13 }
  0xf4   :  { %1482 = vmatmul.mubr.msk.f32.vlgmr.msra.gmra.mxu0 %vm280_vm2, %v411_v3 }
 0x15a   :  { %v186_v14 = vpop.permute.xlu0 %185 }
 0x15b   :  { %v188_v15 = vsel %vm88_vm1, 0.0, %v186_v14 }
 0x15c   :  { %v190_v16 = vrot.slane %v188_v15, 4 }
 0x15e   :  { %v193_v18 = vsel %vm192_vm3, %v178_v17, %v190_v16 }
 0x15f   :  { %265 = vmatmul.mubr.f32.vlgmr.msra.gmra.mxu1 %v193_v18 }
 0x160   :  { %1455 = vmatpush3.msra.mxu1 %v1439_v63  ;;  %1456 = vmatprep.mubr.msk.f32.mxu1 %vm280_vm2, %v1680_v53 }
 0x161   :  { %1464 = vmatprep.subr.mxu1 %v1442_v6 }
 0x163   :  { %1457 = vmatmul.mubr.msk.f32.vlgmr.msra.gmra.mxu1 %vm280_vm2, %v411_v3 }
 0x164   :  { %1465 = vmatpush3.msra.mxu1 %v1442_v6  ;;  %1466 = vmatprep.mubr.msk.f32.mxu1 %vm280_vm2, %v1680_v53 }
 0x165   :  { %1474 = vmatprep.subr.mxu1 %v1445_v8 }
 0x167   :  { %1467 = vmatmul.mubr.msk.f32.vlgmr.msra.gmra.mxu1 %vm280_vm2, %v411_v3 }
 0x168   :  { %1475 = vmatpush3.msra.mxu1 %v1445_v8  ;;  %1476 = vmatprep.mubr.msk.f32.mxu1 %vm280_vm2, %v1680_v53 }
 0x169   :  { %1484 = vmatprep.subr.mxu1 %v1448_v10 }
 0x16b   :  { %1477 = vmatmul.mubr.msk.f32.vlgmr.msra.gmra.mxu1 %vm280_vm2, %v411_v3 }
 0x16c   :  { %1485 = vmatpush3.msra.mxu1 %v1448_v10  ;;  %1486 = vmatprep.mubr.msk.f32.mxu1 %vm280_vm2, %v1680_v53 }
 0x16f   :  { %1487 = vmatmul.mubr.msk.f32.vlgmr.msra.gmra.mxu1 %vm280_vm2, %v411_v3 }
 0x1a8   :  { %v1721_v19 = vpop.f32.mrf.mxu0 }
 0x1a9   :  { %v1207_v25 = vrot.slane %v1721_v19, 2  ;;  %v1190_v26 = vrot.slane %v1721_v19, 1  ;;  %v1224_v27 = vrot.slane %v1721_v19, 3  ;;  %v1241_v28 = vrot.slane %v1721_v19, 4 }
 0x1aa   :  { %v1723_v20 = vpop.f32.mrf.mxu0  ;;  %v1258_v32 = vrot.slane %v1721_v19, 5  ;;  %v1275_v44 = vrot.slane %v1721_v19, 6  ;;  %v1292_v54 = vrot.slane %v1721_v19, 7 }
 0x1ab   :  { %v1048_v30 = vrot.slane %v1723_v20, 1  ;;  %v1065_v31 = vrot.slane %v1723_v20, 2  ;;  %v1082_v41 = vrot.slane %v1723_v20, 3  ;;  %v1099_v45 = vrot.slane %v1723_v20, 4 }
 0x1ac   :  { %v1725_v21 = vpop.f32.mrf.mxu0  ;;  %v1116_v62 = vrot.slane %v1723_v20, 5 }
 0x1ad   :  { %v1192_v29 = vrot.slane %v1725_v21, 7  ;;  %v1227_v34 = vrot.slane %v1725_v21, 1  ;;  %v1244_v36 = vrot.slane %v1725_v21, 2  ;;  %v1261_v37 = vrot.slane %v1725_v21, 3 }
 0x1ae   :  { %v1727_v22 = vpop.f32.mrf.mxu0  ;;  %v1278_v53 = vrot.slane %v1725_v21, 4  ;;  %v1295_v1 = vrot.slane %v1725_v21, 5 }
 0x1af   :  { %v1050_v35 = vrot.slane %v1727_v22, 7  ;;  %v1085_v52 = vrot.slane %v1727_v22, 1  ;;  %v1102_v61 = vrot.slane %v1727_v22, 2  ;;  %v1119_v2 = vrot.slane %v1727_v22, 3 }
 0x1b0   :  { %v1729_v23 = vpop.f32.mrf.mxu0 }
 0x1b1   :  { %v1213_v38 = vrot.slane %v1729_v23, 6  ;;  %v1196_v39 = vrot.slane %v1729_v23, 5  ;;  %v1230_v40 = vrot.slane %v1729_v23, 7  ;;  %v1265_v51 = vrot.slane %v1729_v23, 1 }
 0x1b2   :  { %v1731_v24 = vpop.f32.mrf.mxu0  ;;  %v1282_v60 = vrot.slane %v1729_v23, 2  ;;  %v1299_v6 = vrot.slane %v1729_v23, 3 }
 0x1b3   :  { %v1054_v42 = vrot.slane %v1731_v24, 5  ;;  %v1071_v43 = vrot.slane %v1731_v24, 6  ;;  %v1088_v58 = vrot.slane %v1731_v24, 7 }
 0x1b4   :  { %v1741_v33 = vpop.f32.mrf.mxu0 }
 0x1b5   :  { %v1217_v46 = vrot.slane %v1741_v33, 4  ;;  %v1200_v47 = vrot.slane %v1741_v33, 3  ;;  %v1234_v48 = vrot.slane %v1741_v33, 5  ;;  %v1251_v49 = vrot.slane %v1741_v33, 6 }
 0x1b6   :  { %v1759_v50 = vpop.f32.mrf.mxu0  ;;  %v1268_v57 = vrot.slane %v1741_v33, 7 }
 0x1b7   :  { %v1058_v55 = vrot.slane %v1759_v50, 3  ;;  %v1075_v56 = vrot.slane %v1759_v50, 4  ;;  %v1092_v0 = vrot.slane %v1759_v50, 5  ;;  %v1109_v5 = vrot.slane %v1759_v50, 6 }
 0x21f   :  { %v1769_v59 = vpop.f32.mrf.mxu1 }
 0x221   :  { %v1779_v4 = vpop.f32.mrf.mxu1 }
 0x223   :  { %v1789_v13 = vpop.f32.mrf.mxu1 }
 0x224   :  { %v1208_v18 = vrot.slane %v1789_v13, 1  ;;  %v1191_v3 = vsel %vm1027_vm4, %v1789_v13, %v1190_v26  ;;  %v1225_v10 = vrot.slane %v1789_v13, 2  ;;  %v1242_v17 = vrot.slane %v1789_v13, 3 }
 0x225   :  { %v1801_v7 = vpop.f32.mrf.mxu1  ;;  %v1193_v16 = vsel %vm1030_vm5, %v1192_v29, %v1191_v3  ;;  %v1259_v14 = vrot.slane %v1789_v13, 4  ;;  %v1276_v29 = vrot.slane %v1789_v13, 5 }
 0x226   :  { %v1209_v26 = vsel %vm1027_vm4, %v1208_v18, %v1207_v25  ;;  %v1226_v11 = vsel %vm1027_vm4, %v1225_v10, %v1224_v27  ;;  %v1049_v15 = vsel %vm1027_vm4, %v1801_v7, %v1048_v30  ;;  %v1243_v10 = vsel %vm1027_vm4, %v1242_v17, %v1241_v28 }
 0x227   :  { %v1819_v3 = vpop.f32.mrf.mxu1  ;;  %v1210_v12 = vsel %vm1030_vm5, %v1725_v21, %v1209_v26  ;;  %v1228_v25 = vsel %vm1030_vm5, %v1227_v34, %v1226_v11  ;;  %v1051_v27 = vsel %vm1030_vm5, %v1050_v35, %v1049_v15  ;;  %v1245_v26 = vsel %vm1030_vm5, %v1244_v36, %v1243_v10 }
 0x228   :  { %v1211_v30 = vrot.slane %v1819_v3, 7  ;;  %v1194_v18 = vrot.slane %v1819_v3, 6  ;;  %v1229_v8 = vsel %vm1033_vm6, %v1819_v3, %v1228_v25  ;;  %v1246_v28 = vrot.slane %v1819_v3, 1 }
 0x229   :  { %v1839_v34 = vpop.f32.mrf.mxu1  ;;  %v1231_v35 = vsel %vm1036_vm7, %v1230_v40, %v1229_v8  ;;  %v1066_v11 = vrot.slane %v1801_v7, 1  ;;  %v1260_v15 = vsel %vm1027_vm4, %v1259_v14, %v1258_v32 }
 0x22a   :  { %v1212_v17 = vsel %vm1033_vm6, %v1211_v30, %v1210_v12  ;;  %v1195_v25 = vsel %vm1033_vm6, %v1194_v18, %v1193_v16  ;;  %v1052_v36 = vrot.slane %v1839_v34, 6  ;;  %v1069_v10 = vrot.slane %v1839_v34, 7 }
 0x22b   :  { %v1853_v9 = vpop.f32.mrf.mxu1  ;;  %v1214_v40 = vsel %vm1036_vm7, %v1213_v38, %v1212_v17  ;;  %v1197_v8 = vsel %vm1036_vm7, %v1196_v39, %v1195_v25  ;;  %v1247_v32 = vsel %vm1033_vm6, %v1246_v28, %v1245_v26  ;;  %v1067_v12 = vsel %vm1027_vm4, %v1066_v11, %v1065_v31 }
 0x22c   :  { %v1215_v14 = vrot.slane %v1853_v9, 5  ;;  %v1198_v16 = vrot.slane %v1853_v9, 4  ;;  %v1232_v30 = vrot.slane %v1853_v9, 6  ;;  %v1053_v18 = vsel %vm1033_vm6, %v1052_v36, %v1051_v27 }
 0x22d   :  { %v1869_v63 = vpop.f32.mrf.mxu1  ;;  %v1055_v38 = vsel %vm1036_vm7, %v1054_v42, %v1053_v18  ;;  %v1248_v39 = vsel %vm1036_vm7, %v1729_v23, %v1247_v32  ;;  %v1249_v26 = vrot.slane %v1853_v9, 7  ;;  %v1068_v31 = vsel %vm1030_vm5, %v1727_v22, %v1067_v12 }
 0x22e   :  { %v1216_v28 = vsel %vm1039_vm8, %v1215_v14, %v1214_v40  ;;  %v1199_v11 = vsel %vm1039_vm8, %v1198_v16, %v1197_v8  ;;  %v1233_v27 = vsel %vm1039_vm8, %v1232_v30, %v1231_v35  ;;  %v1056_v17 = vrot.slane %v1869_v63, 4 }
 0x22f   :  { %v1883_v25 = vpop.f32.mrf.mxu1  ;;  %v1218_v42 = vsel %vm1042_vm9, %v1217_v46, %v1216_v28  ;;  %v1201_v36 = vsel %vm1042_vm9, %v1200_v47, %v1199_v11  ;;  %v1235_v40 = vsel %vm1042_vm9, %v1234_v48, %v1233_v27  ;;  %v1250_v8 = vsel %vm1039_vm8, %v1249_v26, %v1248_v39 }
 0x230   :  { %v1219_v35 = vrot.slane %v1883_v25, 3  ;;  %v1202_v32 = vrot.slane %v1883_v25, 2  ;;  %v1236_v12 = vrot.slane %v1883_v25, 4  ;;  %v1057_v14 = vsel %vm1039_vm8, %v1056_v17, %v1055_v38 }
 0x231   :  { %v1899_v16 = vpop.f32.mrf.mxu1  ;;  %v1059_v46 = vsel %vm1042_vm9, %v1058_v55, %v1057_v14  ;;  %v1252_v47 = vsel %vm1042_vm9, %v1251_v49, %v1250_v8  ;;  %v1253_v48 = vrot.slane %v1883_v25, 5  ;;  %v1070_v30 = vsel %vm1033_vm6, %v1069_v10, %v1068_v31 }
 0x232   :  { %v1220_v18 = vsel %vm1045_vm10, %v1219_v35, %v1218_v42  ;;  %v1203_v39 = vsel %vm1045_vm10, %v1202_v32, %v1201_v36  ;;  %v1237_v38 = vsel %vm1045_vm10, %v1236_v12, %v1235_v40  ;;  %v1060_v26 = vrot.slane %v1899_v16, 2 }
 0x233   :  { %1221 = vrot.lane.b32.xlu0 %v1220_v18, %s1554_s5  ;;  %1204 = vrot.lane.b32.xlu1 %v1203_v39, %s1549_s13  ;;  %v1254_v55 = vsel %vm1045_vm10, %v1253_v48, %v1252_v47  ;;  %v1072_v49 = vsel %vm1036_vm7, %v1071_v43, %v1070_v30  ;;  %v1073_v10 = vrot.slane %v1869_v63, 5  ;;  %v1077_v31 = vrot.slane %v1899_v16, 3 }
 0x234   :  { %v1061_v28 = vsel %vm1045_vm10, %v1060_v26, %v1059_v46  ;;  %v1262_v11 = vsel %vm1030_vm5, %v1261_v37, %v1260_v15  ;;  %v1263_v27 = vrot.slane %v1819_v3, 2  ;;  %v1270_v17 = vrot.slane %v1883_v25, 6 }
 0x235   :  { %v1074_v42 = vsel %vm1039_vm8, %v1073_v10, %v1072_v49  ;;  %v1083_v36 = vrot.slane %v1801_v7, 2  ;;  %v1090_v43 = vrot.slane %v1869_v63, 6  ;;  %v1094_v40 = vrot.slane %v1899_v16, 4 }
 0x236   :  { %v1076_v8 = vsel %vm1042_vm9, %v1075_v56, %v1074_v42  ;;  %v1264_v35 = vsel %vm1033_vm6, %v1263_v27, %v1262_v11  ;;  %v1277_v37 = vsel %vm1027_vm4, %v1276_v29, %v1275_v44  ;;  %v1280_v15 = vrot.slane %v1819_v3, 3 }
 0x237   :  { %1238 = vrot.lane.b32.xlu0 %v1237_v38, %s1555_s14  ;;  %1062 = vrot.lane.b32.xlu1 %v1061_v28, %s1549_s13  ;;  %v1078_v32 = vsel %vm1045_vm10, %v1077_v31, %v1076_v8  ;;  %v1266_v56 = vsel %vm1036_vm7, %v1265_v51, %v1264_v35  ;;  %v1084_v12 = vsel %vm1027_vm4, %v1083_v36, %v1082_v41  ;;  %v1284_v14 = vrot.slane %v1853_v9, 1  ;;  %s1556_s13 = smov 80  }
 0x238   :  { %v1267_v44 = vsel %vm1039_vm8, %v1853_v9, %v1266_v56  ;;  %v1086_v29 = vsel %vm1030_vm5, %v1085_v52, %v1084_v12  ;;  %v1279_v46 = vsel %vm1030_vm5, %v1278_v53, %v1277_v37  ;;  %v1287_v47 = vrot.slane %v1883_v25, 7 }
 0x239   :  { %v1269_v51 = vsel %vm1042_vm9, %v1268_v57, %v1267_v44  ;;  %v1087_v41 = vsel %vm1033_vm6, %v1839_v34, %v1086_v29  ;;  %v1281_v48 = vsel %vm1033_vm6, %v1280_v15, %v1279_v46  ;;  %v1100_v30 = vrot.slane %v1801_v7, 3 }
 0x23a   :  { %v1271_v18 = vsel %vm1045_vm10, %v1270_v17, %v1269_v51  ;;  %v1089_v52 = vsel %vm1036_vm7, %v1088_v58, %v1087_v41  ;;  %v1283_v53 = vsel %vm1036_vm7, %v1282_v60, %v1281_v48  ;;  %v1104_v39 = vrot.slane %v1839_v34, 1 }
 0x23b   :  { %1255 = vrot.lane.b32.xlu0 %v1254_v55, %s1552_s3  ;;  %1079 = vrot.lane.b32.xlu1 %v1078_v32, %s1554_s5  ;;  %v1091_v57 = vsel %vm1039_vm8, %v1090_v43, %v1089_v52  ;;  %v1285_v38 = vsel %vm1039_vm8, %v1284_v14, %v1283_v53  ;;  %v1101_v26 = vsel %vm1027_vm4, %v1100_v30, %v1099_v45  ;;  %v1107_v58 = vrot.slane %v1869_v63, 7 }
 0x23c   :  { %v1093_v60 = vsel %vm1042_vm9, %v1092_v0, %v1091_v57  ;;  %v1286_v49 = vsel %vm1042_vm9, %v1741_v33, %v1285_v38  ;;  %v1103_v55 = vsel %vm1030_vm5, %v1102_v61, %v1101_v26  ;;  %v1111_v10 = vrot.slane %v1899_v16, 5 }
 0x23d   :  { %v1095_v31 = vsel %vm1045_vm10, %v1094_v40, %v1093_v60  ;;  %v1288_v28 = vsel %vm1045_vm10, %v1287_v47, %v1286_v49  ;;  %v1105_v45 = vsel %vm1033_vm6, %v1104_v39, %v1103_v55  ;;  %v1293_v11 = vrot.slane %v1789_v13, 6 }
 0x23e   :  { %v1106_v0 = vsel %vm1036_vm7, %v1731_v24, %v1105_v45  ;;  %v1297_v27 = vrot.slane %v1819_v3, 4  ;;  %v1301_v17 = vrot.slane %v1853_v9, 2  ;;  %v1117_v42 = vrot.slane %v1801_v7, 4 }
 0x23f   :  { %1272 = vrot.lane.b32.xlu0 %v1271_v18, %s1556_s13  ;;  %1096 = vrot.lane.b32.xlu1 %v1095_v31, %s1555_s14  ;;  %v1108_v61 = vsel %vm1039_vm8, %v1107_v58, %v1106_v0  ;;  %v1294_v36 = vsel %vm1027_vm4, %v1293_v11, %v1292_v54  ;;  %v1121_v43 = vrot.slane %v1839_v34, 2  ;;  %v1128_v40 = vrot.slane %v1899_v16, 6 }
 0x240   :  { %v1110_v8 = vsel %vm1042_vm9, %v1109_v5, %v1108_v61  ;;  %v1296_v35 = vsel %vm1030_vm5, %v1295_v1, %v1294_v36  ;;  %v1118_v37 = vsel %vm1027_vm4, %v1117_v42, %v1116_v62  ;;  %v1134_v15 = vrot.slane %v1801_v7, 5 }
 0x241   :  { %v1112_v54 = vsel %vm1045_vm10, %v1111_v10, %v1110_v8  ;;  %v1298_v32 = vsel %vm1033_vm6, %v1297_v27, %v1296_v35  ;;  %v1120_v56 = vsel %vm1030_vm5, %v1119_v2, %v1118_v37  ;;  %v1138_v5 = vrot.slane %v1839_v34, 3 }
 0x242   :  { %v1300_v1 = vsel %vm1036_vm7, %v1299_v6, %v1298_v32  ;;  %v1122_v12 = vsel %vm1033_vm6, %v1121_v43, %v1120_v56  ;;  %v2148_v62 = vrot.slane %v1723_v20, 6  ;;  %v1142_v44 = vrot.slane %v1869_v63, 1 }
 0x243   :  { %1289 = vrot.lane.b32.xlu0 %v1288_v28, %s1557_s15  ;;  %1113 = vrot.lane.b32.xlu1 %v1112_v54, %s1552_s3  ;;  %v1302_v2 = vsel %vm1039_vm8, %v1301_v17, %v1300_v1  ;;  %v2149_v29 = vrot.slane %v1731_v24, 1  ;;  %v2150_v6 = vrot.slane %v1727_v22, 4  ;;  %v1145_v51 = vrot.slane %v1899_v16, 7 }
 0x244   :  { %v1135_v14 = vsel %vm1027_vm4, %v1134_v15, %v2148_v62  ;;  %v2151_v41 = vrot.slane %v1741_v33, 1  ;;  %v1151_v52 = vrot.slane %v1801_v7, 6  ;;  %v2152_v39 = vrot.slane %v1759_v50, 7 }
 0x245   :  { %v1124_v46 = vsel %vm1036_vm7, %v2149_v29, %v1122_v12  ;;  %v1137_v47 = vsel %vm1030_vm5, %v2150_v6, %v1135_v14  ;;  %v2153_v38 = vrot.slane %v1731_v24, 2  ;;  %v1155_v58 = vrot.slane %v1839_v34, 4 }
 0x246   :  { %v1304_v48 = vsel %vm1042_vm9, %v2151_v41, %v1302_v2  ;;  %v1125_v30 = vsel %vm1039_vm8, %v1869_v63, %v1124_v46  ;;  %v1139_v18 = vsel %vm1033_vm6, %v1138_v5, %v1137_v47  ;;  %v2154_v55 = vrot.slane %v1723_v20, 7 }
 0x247   :  { %v1305_v53 = vsel %vm1045_vm10, %v1883_v25, %v1304_v48  ;;  %v1127_v57 = vsel %vm1042_vm9, %v2152_v39, %v1125_v30  ;;  %v1141_v26 = vsel %vm1036_vm7, %v2153_v38, %v1139_v18  ;;  %v1159_v31 = vrot.slane %v1869_v63, 2 }
 0x248   :  { %v1129_v60 = vsel %vm1045_vm10, %v1128_v40, %v1127_v57  ;;  %v1143_v49 = vsel %vm1039_vm8, %v1142_v44, %v1141_v26  ;;  %v1152_v10 = vsel %vm1027_vm4, %v1151_v52, %v2154_v55  ;;  %v1026_v28 = vrot.slane %v1801_v7, 7  ;;  %1306 = vrot.lane.b32.xlu0 %v1305_v53, %s1558_s16 }
 0x249   :  { %1130 = vrot.lane.b32.xlu1 %v1129_v60, %s1556_s13  ;;  %v2155_v45 = vrot.slane %v1727_v22, 5  ;;  %v2156_v0 = vrot.slane %v1789_v13, 7  ;;  %v1179_v17 = vrot.slane %v1819_v3, 5  ;;  %v2157_v7 = vrot.slane %v1725_v21, 6 }
 0x24a   :  { %v1183_v36 = vrot.slane %v1853_v9, 3  ;;  %v1185_v43 = vrot.slane %v1741_v33, 2  ;;  %v1144_v40 = vsel %vm1042_vm9, %v1759_v50, %v1143_v49  ;;  %v2158_v8 = vrot.slane %v1731_v24, 3 }
 0x24b   :  { %v1154_v11 = vsel %vm1030_vm5, %v2155_v45, %v1152_v10  ;;  %v1176_v27 = vsel %vm1027_vm4, %v2156_v0, %v1721_v19  ;;  %v1187_v3 = vrot.slane %v1883_v25, 1  ;;  %v1146_v35 = vsel %vm1045_vm10, %v1145_v51, %v1144_v40 }
 0x24c   :  { %v1156_v42 = vsel %vm1033_vm6, %v1155_v58, %v1154_v11  ;;  %v1178_v61 = vsel %vm1030_vm5, %v2157_v7, %v1176_v27  ;;  %v2159_v37 = vrot.slane %v1729_v23, 4  ;;  %v1035_v33 = vrot.slane %v1731_v24, 4 }
 0x24d   :  { %v1158_v13 = vsel %vm1036_vm7, %v2158_v8, %v1156_v42  ;;  %v1180_v19 = vsel %vm1033_vm6, %v1179_v17, %v1178_v61  ;;  %1147 = vrot.lane.b32.xlu1 %v1146_v35, %s1557_s15  ;;  %v2160_v15 = vrot.slane %v1759_v50, 1  ;;  %v1028_v25 = vsel %vm1027_vm4, %v1026_v28, %v1723_v20 }
 0x24e   :  { %v1160_v21 = vsel %vm1039_vm8, %v1159_v31, %v1158_v13  ;;  %v1182_v9 = vsel %vm1036_vm7, %v2159_v37, %v1180_v19  ;;  %v1032_v56 = vrot.slane %v1839_v34, 5  ;;  %v2161_v23 = vrot.slane %v1727_v22, 6 }
 0x24f   :  { %v1162_v54 = vsel %vm1042_vm9, %v2160_v15, %v1160_v21  ;;  %v1184_v32 = vsel %vm1039_vm8, %v1183_v36, %v1182_v9  ;;  %v1038_v24 = vrot.slane %v1869_v63, 3  ;;  %v1041_v12 = vrot.slane %v1759_v50, 2  ;;  %v198_v50 = vpop.permute.xlu0 %197 }
 0x250   :  { %v1186_v5 = vsel %vm1042_vm9, %v1185_v43, %v1184_v32  ;;  %v1031_v1 = vsel %vm1030_vm5, %v2161_v23, %v1028_v25  ;;  %v1044_v44 = vrot.slane %v1899_v16, 1  ;;  %v1163_v20 = vsel %vm1045_vm10, %v1899_v16, %v1162_v54 }
 0x251   :  { %v1188_v62 = vsel %vm1045_vm10, %v1187_v3, %v1186_v5  ;;  %v1034_v14 = vsel %vm1033_vm6, %v1032_v56, %v1031_v1  ;;  %1164 = vrot.lane.b32.xlu1 %v1163_v20, %s1558_s16  ;;  %v269_v26 = vadd.f32 %v1779_v4, %v198_v50  ;;  %v267_v4 = vadd.f32 %v1769_v59, %v198_v50 }
 0x252   :  { %v1037_v34 = vsel %vm1036_vm7, %v1035_v33, %v1034_v14 }
 0x253   :  { %v1040_v22 = vsel %vm1039_vm8, %v1038_v24, %v1037_v34 }
 0x254   :  { %v1043_v2 = vsel %vm1042_vm9, %v1041_v12, %v1040_v22 }
 0x255   :  { %v1046_v63 = vsel %vm1045_vm10, %v1044_v44, %v1043_v2 }
 0x2a5   :  { %v1222_v29 = vpop.permute.xlu0 %1221  ;;  %v1205_v46 = vpop.permute.xlu1 %1204 }
 0x2a6   :  { %v1322_v30 = vsel %vm1309_vm11, %v1188_v62, %v1205_v46 }
 0x2a7   :  { %v1323_v18 = vsel %vm1311_vm12, %v1322_v30, %v1222_v29 }
 0x2a9   :  { %v1239_v6 = vpop.permute.xlu0 %1238  ;;  %v1063_v47 = vpop.permute.xlu1 %1062 }
 0x2aa   :  { %v1324_v39 = vsel %vm1313_vm13, %v1323_v18, %v1239_v6  ;;  %v1310_v31 = vsel %vm1309_vm11, %v1046_v63, %v1063_v47 }
 0x2ad   :  { %v1256_v51 = vpop.permute.xlu0 %1255  ;;  %v1080_v41 = vpop.permute.xlu1 %1079 }
 0x2ae   :  { %v1325_v57 = vsel %vm88_vm1, %v1324_v39, %v1256_v51  ;;  %v1312_v28 = vsel %vm1311_vm12, %v1310_v31, %v1080_v41 }
 0x2b1   :  { %v1273_v48 = vpop.permute.xlu0 %1272  ;;  %v1097_v16 = vpop.permute.xlu1 %1096 }
 0x2b2   :  { %v1326_v38 = vsel %vm1316_vm14, %v1325_v57, %v1273_v48  ;;  %v1314_v11 = vsel %vm1313_vm13, %v1312_v28, %v1097_v16 }
 0x2b5   :  { %v1290_v52 = vpop.permute.xlu0 %1289  ;;  %v1114_v53 = vpop.permute.xlu1 %1113 }
 0x2b6   :  { %v1327_v58 = vsel %vm1318_vm15, %v1326_v38, %v1290_v52  ;;  %v1315_v0 = vsel %vm88_vm1, %v1314_v11, %v1114_v53 }
 0x2ba   :  { %v1307_v60 = vpop.permute.xlu0 %1306 }
 0x2bb   :  { %v1131_v49 = vpop.permute.xlu1 %1130  ;;  %v1328_v55 = vsel %vm1320_vm0, %v1327_v58, %v1307_v60 }
 0x2bc   :  { %v1330_v10 = vadd.f32 %v1328_v55, %v269_v26  ;;  %v1317_v27 = vsel %vm1316_vm14, %v1315_v0, %v1131_v49 }
 0x2be   :  { %1332 = vst [vmem:[#allocation5 + $0x8] sm:$0xff] %v1330_v10 }
 0x2bf   :  { %v1148_v45 = vpop.permute.xlu1 %1147 }
 0x2c0   :  { %v1319_v17 = vsel %vm1318_vm15, %v1317_v27, %v1148_v45 }
 0x2c3   :  { %v1165_v42 = vpop.permute.xlu1 %1164 }
 0x2c4   :  { %v1321_v7 = vsel %vm1320_vm0, %v1319_v17, %v1165_v42 }
 0x2c5   :  { %v1329_v61 = vadd.f32 %v1321_v7, %v267_v4 }
 0x2c7   :  { %1331 = vst [vmem:[#allocation5] sm:$0xff] %v1329_v61 }
 0x2c8   :  { %1534 = shalt.err (!%p1531_p9)
}
 0x2c9   :  { %1342 = dma.vmem_to_hbm [thread:$0]  %s1340_s1, 256, %s2147_s9, [#allocation4]  }
 0x2ca   :  { %1545 = dma.done.wait [#allocation4], 256  }
 0x2cb   :  { %1546 = vsyncadd [#allocation4], 4294967040 }
 0x2cc   :  { %1346 = vsyncpa [#allocation3], 1 }
 0x2cd   :  { %1347 = vsyncpa [#allocation4], 1 }

</bundles_post_ra>
